<compile_context>
chip_gen: v6e
topology: v6e:2x2x1
jax: 0.10.0
libtpu: 0.0.40
codegen_flags: <defaults>
</compile_context>

<pallas_src>
from functools import partial

import jax
import jax.numpy as jnp
from jax.experimental import pallas as pl
from jax.experimental.pallas import tpu as pltpu

LANE = 128


def _round_up(n, m):
    return ((n + m - 1) // m) * m


def _mlp_kernel(x_ref, w_ref, b_ref, o_ref):
    """Fused 7-layer MLP on one batch tile.

    x_ref: (batch_tile, D) bf16   w_ref: (L, D, D) bf16
    b_ref: (L, D) f32             o_ref: (batch_tile, out_pad) f32
    """
    num_layers = w_ref.shape[0]
    out_pad = o_ref.shape[-1]

    h = x_ref[...]                                        # bf16 activations
    for l in range(num_layers - 1):                       # static unroll over layers
        y = jnp.dot(h, w_ref[l],                          # bf16 MXU matmul
                    preferred_element_type=jnp.float32)   # f32 accumulation
        h = jnp.maximum(y + b_ref[l], 0.0).astype(jnp.bfloat16)  # f32 bias+ReLU (VPU)

    # Last layer: only compute/write the (128-aligned) output lanes.
    l = num_layers - 1
    y = jnp.dot(h, w_ref[l][:, :out_pad],
                preferred_element_type=jnp.float32)
    o_ref[...] = jnp.maximum(y + b_ref[l][:out_pad], 0.0).astype(o_ref.dtype)


def pack_params(params):
    """One-time packing: zero-pad each (W(in,out), b(out,)) to a common 128-lane
    square and stack -> (L, d_pad, d_pad) bf16 weights, (L, d_pad) f32 biases."""
    # Robustness: each layer's fan_in must equal the previous layer's fan_out.
    for (w_prev, _), (w_next, _) in zip(params[:-1], params[1:]):
        assert w_prev.shape[1] == w_next.shape[0], "layer dims do not chain"

    dims = [params[0][0].shape[0]] + [w.shape[1] for w, _ in params]
    d_pad = _round_up(max(dims), LANE)

    ws, bs = [], []
    for w, b in params:
        fan_in, fan_out = w.shape
        w_p = jnp.zeros((d_pad, d_pad), jnp.float32).at[:fan_in, :fan_out].set(w)
        b_p = jnp.zeros((d_pad,), jnp.float32).at[:fan_out].set(b.reshape(-1))
        ws.append(w_p)
        bs.append(b_p)
    return jnp.stack(ws).astype(jnp.bfloat16), jnp.stack(bs)


@partial(jax.jit, static_argnames=("output_dim", "batch_tile"))
def complex_processing_module(x, w_stack, b_stack, *, output_dim, batch_tile=None):
    """x: (batch, input_dim) f32. w_stack: (L, D, D) bf16. b_stack: (L, D) f32."""
    batch, input_dim = x.shape
    num_layers, d_pad, _ = w_stack.shape
    out_pad = _round_up(output_dim, LANE)
    assert out_pad <= d_pad

    # Batch tiling policy (see header).
    if batch_tile is None:
        if batch <= 32:
            batch_tile = _round_up(batch, 16)            # single grid step
        elif batch <= 1024:
            batch_tile = _round_up((batch + 1) // 2, 16)  # grid >= 2 (v7x: 2 TCs)
        else:
            batch_tile = 512                              # multiple of 256, grid >= 2
    assert batch_tile % 16 == 0, "batch_tile must be a multiple of 16 (bf16 sublanes)"
    padded_batch = _round_up(batch, batch_tile)

    # Pad batch rows / feature lanes with zeros and cast to bf16 (fuses under jit).
    x_b = x.astype(jnp.bfloat16)
    if padded_batch != batch or d_pad != input_dim:
        x_p = (jnp.zeros((padded_batch, d_pad), jnp.bfloat16)
               .at[:batch, :input_dim].set(x_b))
    else:
        x_p = x_b

    grid = (padded_batch // batch_tile,)

    cost = pl.CostEstimate(
        flops=2 * num_layers * padded_batch * d_pad * d_pad,
        transcendentals=0,
        bytes_accessed=(x_p.size * 2 + w_stack.size * 2 + b_stack.size * 4
                        + padded_batch * out_pad * 4),
    )

    out = pl.pallas_call(
        _mlp_kernel,
        out_shape=jax.ShapeDtypeStruct((padded_batch, out_pad), jnp.float32),
        grid_spec=pltpu.PrefetchScalarGridSpec(
            num_scalar_prefetch=0,
            grid=grid,
            in_specs=[
                pl.BlockSpec((batch_tile, d_pad), lambda i: (i, 0)),
                # Grid-invariant stacked weights / biases: same block every step,
                # stay resident in VMEM.
                pl.BlockSpec((num_layers, d_pad, d_pad), lambda i: (0, 0, 0)),
                pl.BlockSpec((num_layers, d_pad), lambda i: (0, 0)),
            ],
            out_specs=pl.BlockSpec((batch_tile, out_pad), lambda i: (i, 0)),
        ),
        compiler_params=pltpu.CompilerParams(
            dimension_semantics=("parallel",)),
        cost_estimate=cost,
    )(x_p, w_stack, b_stack)

    return out[:batch, :output_dim]


def init_params(key, input_dim, hidden_dim, output_dim):
    """Mimics nn.Linear default init (U[-1/sqrt(fan_in), 1/sqrt(fan_in)]).

    Weights are stored already transposed as (in, out) so the kernel does x @ W.
    """
    dims = [(input_dim, hidden_dim),
            (hidden_dim, hidden_dim),
            (hidden_dim, output_dim),
            (output_dim, hidden_dim),
            (hidden_dim, output_dim),
            (output_dim, hidden_dim),
            (hidden_dim, output_dim)]
    params = []
    for fan_in, fan_out in dims:
        key, kw, kb = jax.random.split(key, 3)
        bound = 1.0 / jnp.sqrt(fan_in)
        w = jax.random.uniform(kw, (fan_in, fan_out), jnp.float32,
                               minval=-bound, maxval=bound)
        b = jax.random.uniform(kb, (fan_out,), jnp.float32,
                               minval=-bound, maxval=bound)
        params.append((w, b))
    return params


def reference_forward(x, params):
    """Pure-JAX reference with the same numerics (bf16 matmul, f32 accumulate)."""
    h = x.astype(jnp.float32)
    for w, b in params:
        y = jnp.dot(h.astype(jnp.bfloat16), w.astype(jnp.bfloat16),
                    preferred_element_type=jnp.float32)
        h = jnp.maximum(y + b[None, :], 0.0)
    return h


if __name__ == "__main__":
    key = jax.random.PRNGKey(0)
    k_x, k_p = jax.random.split(key)

    batch, input_dim, hidden_dim, output_dim = 16, 16, 32, 16
    x = jax.random.normal(k_x, (batch, input_dim), jnp.float32)
    params = init_params(k_p, input_dim, hidden_dim, output_dim)

    # One-time packing (hoisted out of the jitted forward).
    w_stack, b_stack = pack_params(params)

    out = complex_processing_module(x, w_stack, b_stack, output_dim=output_dim)
    out = jax.block_until_ready(out)

    ref = reference_forward(x, params)
    assert out.shape == (batch, output_dim)
    assert jnp.allclose(out, ref, atol=1e-2, rtol=1e-2), "mismatch vs JAX reference"

    print("KERNEL_OK")
</pallas_src>

<mosaic_0001>
module attributes {stable_mosaic.version = 11 : i64} {
  func.func @_mlp_kernel(%arg0: i32, %arg1: memref<16x128xbf16, #tpu.memory_space<vmem>>, %arg2: memref<7x128x128xbf16, #tpu.memory_space<vmem>>, %arg3: memref<7x128xf32, #tpu.memory_space<vmem>>, %arg4: memref<16x128xf32, #tpu.memory_space<vmem>>) attributes {dimension_semantics = [#tpu.dimension_semantics<parallel>], iteration_bounds = array<i64: 1>, scalar_prefetch = 0 : i64, scratch_operands = 0 : i64, tpu.core_type = #tpu.core_type<tc>, window_params = [{transform_indices = @transform_0, window_bounds = array<i64: 16, 128>}, {pipeline_mode = #tpu.pipeline_mode<synchronous>, transform_indices = @transform_1, window_bounds = array<i64: 7, 128, 128>}, {pipeline_mode = #tpu.pipeline_mode<synchronous>, transform_indices = @transform_2, window_bounds = array<i64: 7, 128>}, {transform_indices = @transform_3, window_bounds = array<i64: 16, 128>}]} {
    %c0 = arith.constant 0 : index
    %c0_0 = arith.constant 0 : index
    %0 = vector.load %arg1[%c0, %c0_0] : memref<16x128xbf16, #tpu.memory_space<vmem>>, vector<16x128xbf16>
    %c0_1 = arith.constant 0 : index
    %c0_2 = arith.constant 0 : index
    %c0_3 = arith.constant 0 : index
    %1 = vector.load %arg2[%c0_1, %c0_2, %c0_3] : memref<7x128x128xbf16, #tpu.memory_space<vmem>>, vector<1x128x128xbf16>
    %2 = vector.shape_cast %1 : vector<1x128x128xbf16> to vector<128x128xbf16>
    %cst = arith.constant dense<0.000000e+00> : vector<16x128xf32>
    %3 = tpu.matmul %0, %2, %cst {dimension_numbers = #tpu.dot_dimension_numbers<[1], [0], [0], [1], [0, 0, 1, 1], [], []>} : vector<16x128xbf16>, vector<128x128xbf16>, vector<16x128xf32> -> vector<16x128xf32>
    %c0_4 = arith.constant 0 : index
    %c0_5 = arith.constant 0 : index
    %4 = vector.load %arg3[%c0_4, %c0_5] : memref<7x128xf32, #tpu.memory_space<vmem>>, vector<1x128xf32>
    %5 = vector.shape_cast %4 : vector<1x128xf32> to vector<128xf32>
    %6 = vector.shape_cast %5 : vector<128xf32> to vector<1x128xf32>
    %7 = vector.broadcast %6 : vector<1x128xf32> to vector<16x128xf32>
    %8 = arith.addf %3, %7 : vector<16x128xf32>
    %cst_6 = arith.constant 0.000000e+00 : f32
    %9 = vector.broadcast %cst_6 : f32 to vector<16x128xf32>
    %10 = arith.maximumf %8, %9 : vector<16x128xf32>
    %11 = arith.truncf %10 : vector<16x128xf32> to vector<16x128xbf16>
    %c1 = arith.constant 1 : index
    %c0_7 = arith.constant 0 : index
    %c0_8 = arith.constant 0 : index
    %12 = vector.load %arg2[%c1, %c0_7, %c0_8] : memref<7x128x128xbf16, #tpu.memory_space<vmem>>, vector<1x128x128xbf16>
    %13 = vector.shape_cast %12 : vector<1x128x128xbf16> to vector<128x128xbf16>
    %cst_9 = arith.constant dense<0.000000e+00> : vector<16x128xf32>
    %14 = tpu.matmul %11, %13, %cst_9 {dimension_numbers = #tpu.dot_dimension_numbers<[1], [0], [0], [1], [0, 0, 1, 1], [], []>} : vector<16x128xbf16>, vector<128x128xbf16>, vector<16x128xf32> -> vector<16x128xf32>
    %c1_10 = arith.constant 1 : index
    %c0_11 = arith.constant 0 : index
    %15 = vector.load %arg3[%c1_10, %c0_11] : memref<7x128xf32, #tpu.memory_space<vmem>>, vector<1x128xf32>
    %16 = vector.shape_cast %15 : vector<1x128xf32> to vector<128xf32>
    %17 = vector.shape_cast %16 : vector<128xf32> to vector<1x128xf32>
    %18 = vector.broadcast %17 : vector<1x128xf32> to vector<16x128xf32>
    %19 = arith.addf %14, %18 : vector<16x128xf32>
    %cst_12 = arith.constant 0.000000e+00 : f32
    %20 = vector.broadcast %cst_12 : f32 to vector<16x128xf32>
    %21 = arith.maximumf %19, %20 : vector<16x128xf32>
    %22 = arith.truncf %21 : vector<16x128xf32> to vector<16x128xbf16>
    %c2 = arith.constant 2 : index
    %c0_13 = arith.constant 0 : index
    %c0_14 = arith.constant 0 : index
    %23 = vector.load %arg2[%c2, %c0_13, %c0_14] : memref<7x128x128xbf16, #tpu.memory_space<vmem>>, vector<1x128x128xbf16>
    %24 = vector.shape_cast %23 : vector<1x128x128xbf16> to vector<128x128xbf16>
    %cst_15 = arith.constant dense<0.000000e+00> : vector<16x128xf32>
    %25 = tpu.matmul %22, %24, %cst_15 {dimension_numbers = #tpu.dot_dimension_numbers<[1], [0], [0], [1], [0, 0, 1, 1], [], []>} : vector<16x128xbf16>, vector<128x128xbf16>, vector<16x128xf32> -> vector<16x128xf32>
    %c2_16 = arith.constant 2 : index
    %c0_17 = arith.constant 0 : index
    %26 = vector.load %arg3[%c2_16, %c0_17] : memref<7x128xf32, #tpu.memory_space<vmem>>, vector<1x128xf32>
    %27 = vector.shape_cast %26 : vector<1x128xf32> to vector<128xf32>
    %28 = vector.shape_cast %27 : vector<128xf32> to vector<1x128xf32>
    %29 = vector.broadcast %28 : vector<1x128xf32> to vector<16x128xf32>
    %30 = arith.addf %25, %29 : vector<16x128xf32>
    %cst_18 = arith.constant 0.000000e+00 : f32
    %31 = vector.broadcast %cst_18 : f32 to vector<16x128xf32>
    %32 = arith.maximumf %30, %31 : vector<16x128xf32>
    %33 = arith.truncf %32 : vector<16x128xf32> to vector<16x128xbf16>
    %c3 = arith.constant 3 : index
    %c0_19 = arith.constant 0 : index
    %c0_20 = arith.constant 0 : index
    %34 = vector.load %arg2[%c3, %c0_19, %c0_20] : memref<7x128x128xbf16, #tpu.memory_space<vmem>>, vector<1x128x128xbf16>
    %35 = vector.shape_cast %34 : vector<1x128x128xbf16> to vector<128x128xbf16>
    %cst_21 = arith.constant dense<0.000000e+00> : vector<16x128xf32>
    %36 = tpu.matmul %33, %35, %cst_21 {dimension_numbers = #tpu.dot_dimension_numbers<[1], [0], [0], [1], [0, 0, 1, 1], [], []>} : vector<16x128xbf16>, vector<128x128xbf16>, vector<16x128xf32> -> vector<16x128xf32>
    %c3_22 = arith.constant 3 : index
    %c0_23 = arith.constant 0 : index
    %37 = vector.load %arg3[%c3_22, %c0_23] : memref<7x128xf32, #tpu.memory_space<vmem>>, vector<1x128xf32>
    %38 = vector.shape_cast %37 : vector<1x128xf32> to vector<128xf32>
    %39 = vector.shape_cast %38 : vector<128xf32> to vector<1x128xf32>
    %40 = vector.broadcast %39 : vector<1x128xf32> to vector<16x128xf32>
    %41 = arith.addf %36, %40 : vector<16x128xf32>
    %cst_24 = arith.constant 0.000000e+00 : f32
    %42 = vector.broadcast %cst_24 : f32 to vector<16x128xf32>
    %43 = arith.maximumf %41, %42 : vector<16x128xf32>
    %44 = arith.truncf %43 : vector<16x128xf32> to vector<16x128xbf16>
    %c4 = arith.constant 4 : index
    %c0_25 = arith.constant 0 : index
    %c0_26 = arith.constant 0 : index
    %45 = vector.load %arg2[%c4, %c0_25, %c0_26] : memref<7x128x128xbf16, #tpu.memory_space<vmem>>, vector<1x128x128xbf16>
    %46 = vector.shape_cast %45 : vector<1x128x128xbf16> to vector<128x128xbf16>
    %cst_27 = arith.constant dense<0.000000e+00> : vector<16x128xf32>
    %47 = tpu.matmul %44, %46, %cst_27 {dimension_numbers = #tpu.dot_dimension_numbers<[1], [0], [0], [1], [0, 0, 1, 1], [], []>} : vector<16x128xbf16>, vector<128x128xbf16>, vector<16x128xf32> -> vector<16x128xf32>
    %c4_28 = arith.constant 4 : index
    %c0_29 = arith.constant 0 : index
    %48 = vector.load %arg3[%c4_28, %c0_29] : memref<7x128xf32, #tpu.memory_space<vmem>>, vector<1x128xf32>
    %49 = vector.shape_cast %48 : vector<1x128xf32> to vector<128xf32>
    %50 = vector.shape_cast %49 : vector<128xf32> to vector<1x128xf32>
    %51 = vector.broadcast %50 : vector<1x128xf32> to vector<16x128xf32>
    %52 = arith.addf %47, %51 : vector<16x128xf32>
    %cst_30 = arith.constant 0.000000e+00 : f32
    %53 = vector.broadcast %cst_30 : f32 to vector<16x128xf32>
    %54 = arith.maximumf %52, %53 : vector<16x128xf32>
    %55 = arith.truncf %54 : vector<16x128xf32> to vector<16x128xbf16>
    %c5 = arith.constant 5 : index
    %c0_31 = arith.constant 0 : index
    %c0_32 = arith.constant 0 : index
    %56 = vector.load %arg2[%c5, %c0_31, %c0_32] : memref<7x128x128xbf16, #tpu.memory_space<vmem>>, vector<1x128x128xbf16>
    %57 = vector.shape_cast %56 : vector<1x128x128xbf16> to vector<128x128xbf16>
    %cst_33 = arith.constant dense<0.000000e+00> : vector<16x128xf32>
    %58 = tpu.matmul %55, %57, %cst_33 {dimension_numbers = #tpu.dot_dimension_numbers<[1], [0], [0], [1], [0, 0, 1, 1], [], []>} : vector<16x128xbf16>, vector<128x128xbf16>, vector<16x128xf32> -> vector<16x128xf32>
    %c5_34 = arith.constant 5 : index
    %c0_35 = arith.constant 0 : index
    %59 = vector.load %arg3[%c5_34, %c0_35] : memref<7x128xf32, #tpu.memory_space<vmem>>, vector<1x128xf32>
    %60 = vector.shape_cast %59 : vector<1x128xf32> to vector<128xf32>
    %61 = vector.shape_cast %60 : vector<128xf32> to vector<1x128xf32>
    %62 = vector.broadcast %61 : vector<1x128xf32> to vector<16x128xf32>
    %63 = arith.addf %58, %62 : vector<16x128xf32>
    %cst_36 = arith.constant 0.000000e+00 : f32
    %64 = vector.broadcast %cst_36 : f32 to vector<16x128xf32>
    %65 = arith.maximumf %63, %64 : vector<16x128xf32>
    %66 = arith.truncf %65 : vector<16x128xf32> to vector<16x128xbf16>
    %c6 = arith.constant 6 : index
    %c0_37 = arith.constant 0 : index
    %c0_38 = arith.constant 0 : index
    %67 = vector.load %arg2[%c6, %c0_37, %c0_38] : memref<7x128x128xbf16, #tpu.memory_space<vmem>>, vector<1x128x128xbf16>
    %68 = vector.shape_cast %67 : vector<1x128x128xbf16> to vector<128x128xbf16>
    %cst_39 = arith.constant dense<0.000000e+00> : vector<16x128xf32>
    %69 = tpu.matmul %66, %68, %cst_39 {dimension_numbers = #tpu.dot_dimension_numbers<[1], [0], [0], [1], [0, 0, 1, 1], [], []>} : vector<16x128xbf16>, vector<128x128xbf16>, vector<16x128xf32> -> vector<16x128xf32>
    %c6_40 = arith.constant 6 : index
    %c0_41 = arith.constant 0 : index
    %70 = vector.load %arg3[%c6_40, %c0_41] : memref<7x128xf32, #tpu.memory_space<vmem>>, vector<1x128xf32>
    %71 = vector.shape_cast %70 : vector<1x128xf32> to vector<128xf32>
    %72 = vector.shape_cast %71 : vector<128xf32> to vector<1x128xf32>
    %73 = vector.broadcast %72 : vector<1x128xf32> to vector<16x128xf32>
    %74 = arith.addf %69, %73 : vector<16x128xf32>
    %cst_42 = arith.constant 0.000000e+00 : f32
    %75 = vector.broadcast %cst_42 : f32 to vector<16x128xf32>
    %76 = arith.maximumf %74, %75 : vector<16x128xf32>
    %c0_43 = arith.constant 0 : index
    %c0_44 = arith.constant 0 : index
    %77 = vector.load %arg4[%c0_43, %c0_44] : memref<16x128xf32, #tpu.memory_space<vmem>>, vector<16x128xf32>
    tpu.vector_store %arg4[%c0_43, %c0_44], %76 {strides = array<i32>} : memref<16x128xf32, #tpu.memory_space<vmem>>, vector<16x128xf32>,
    return
  }
  func.func @transform_0(%arg0: i32) -> (i32, i32) {
    %c0_i32 = arith.constant 0 : i32
    %c0_i32_0 = arith.constant 0 : i32
    return %arg0, %c0_i32 : i32, i32
  }
  func.func @transform_1(%arg0: i32) -> (i32, i32, i32) {
    %c0_i32 = arith.constant 0 : i32
    %c0_i32_0 = arith.constant 0 : i32
    %c0_i32_1 = arith.constant 0 : i32
    %c0_i32_2 = arith.constant 0 : i32
    return %c0_i32, %c0_i32_0, %c0_i32_1 : i32, i32, i32
  }
  func.func @transform_2(%arg0: i32) -> (i32, i32) {
    %c0_i32 = arith.constant 0 : i32
    %c0_i32_0 = arith.constant 0 : i32
    %c0_i32_1 = arith.constant 0 : i32
    return %c0_i32, %c0_i32_0 : i32, i32
  }
  func.func @transform_3(%arg0: i32) -> (i32, i32) {
    %c0_i32 = arith.constant 0 : i32
    %c0_i32_0 = arith.constant 0 : i32
    return %arg0, %c0_i32 : i32, i32
  }
}

</mosaic_0001>

<bundles_post_ra>
// kernel: complex_processing_module.1
= control target key start
LH: loop header
LB: loop body
LE: loop exit
PB: predicated region body
PF: predicated region fallthrough
CT: control target
= control target key end

     0   :  { %8 = vsyncpa [#allocation3], 0  ;;  %s1357_s0 = inlined_call_operand.vmem [shape: bf16[16,128], index: 0, kind: input, shape index: {}]   ;;  %s1358_s1 = inlined_call_operand.hbm [shape: bf16[7,128,128], index: 1, kind: input, shape index: {}]   ;;  %s1359_s2 = inlined_call_operand.vmem [shape: f32[7,128], index: 2, kind: input, shape index: {}]   ;;  %s1360_s3 = inlined_call_operand.hbm [shape: f32[16,128], index: 3, kind: output, shape index: {}]  }
   0x1   :  { %9 = vsyncpa [#allocation4], 0  ;;  %s1229_s12 = smov [#allocation2]  }
   0x2   :  { %s17_s13 = sshll.u32 %s1229_s12, 4  ;;  %s18_s13 = int_to_ptr.vmem [resolvable:$true] %s17_s13 }
   0x3   :  { %s1193_s14 = scalar_lea.vmem %s18_s13, 7168  ;;  %p1198_p1 = scmp.lt.s32.totalorder %s18_s13, %s18_s13 }
   0x4   :  { %p1194_p0 = scmp.ne.s32.totalorder %s18_s13, %s1193_s14  ;;  %p1199_p2 = scmp.lt.s32.totalorder %s1193_s14, %s1193_s14 }
   0x6   :  { %p1200_p3 = por %p1199_p2, %p1198_p1 }
   0x8   :  { %p1201_p4 = pnand %p1200_p3, %p1194_p0 }
   0xa   :  { %1204 = shalt.err (!%p1201_p4)
}
   0xb   :  { %s1230_s15 = smov 64   ;;  %s1231_s16 = smov 4  }
   0xc   :  { %23 = dma.hbm_to_vmem [thread:$0]  %s1358_s1, 7168, %s18_s13, [#allocation3], %s1230_s15, %s1230_s15, %s1231_s16  }
   0xd   :  { %1225 = dma.done.wait [#allocation3], 7168  }
   0xe   :  { %1226 = vsyncadd [#allocation3], 4294960128  ;;  %v1232_v0 = vmov 0.0   ;;  %vm1233_vm0 = vmmov 0   ;;  %v1128_v1 = vld [vmem:[#allocation2 + $0x38] sm:$0xff]   ;;  %v1129_v2 = vld [vmem:[#allocation2 + $0x30] sm:$0xff]  }
   0xf   :  { %980 = vmatprep.subr.bf16.mxu0 %v1232_v0  ;;  %996 = vmatprep.mubr.msk.bf16.mxu0 %vm1233_vm0, %v1232_v0  ;;  %v1130_v3 = vld [vmem:[#allocation2 + $0x28] sm:$0xff]   ;;  %v1137_v4 = vld [vmem:[#allocation2 + $0x78] sm:$0xff]   ;;  %v1131_v5 = vld [vmem:[#allocation2 + $0x20] sm:$0xff]   ;;  %s1234_s6 = smov [#allocation5]  }
  0x10   :  { %1000 = vmatprep.subr.bf16.mxu1 %v1232_v0  ;;  %1016 = vmatprep.mubr.msk.bf16.mxu1 %vm1233_vm0, %v1232_v0  ;;  %v1138_v6 = vld [vmem:[#allocation2 + $0x70] sm:$0xff]   ;;  %v1132_v7 = vld [vmem:[#allocation2 + $0x18] sm:$0xff]   ;;  %v1139_v8 = vld [vmem:[#allocation2 + $0x68] sm:$0xff]   ;;  %s841_s7 = sshll.u32 %s1234_s6, 4  ;;  %s842_s7 = int_to_ptr.vmem [resolvable:$true] %s841_s7 }
  0x11   :  { %981 = vmatpush3.bf16.msra.mxu0 %v1128_v1  ;;  %1001 = vmatpush3.bf16.msra.mxu1 %v1137_v4  ;;  %v1133_v9 = vld [vmem:[#allocation2 + $0x10] sm:$0xff]   ;;  %v1140_v10 = vld [vmem:[#allocation2 + $0x60] sm:$0xff]   ;;  %v1134_v11 = vld [vmem:[#allocation2 + $0x8] sm:$0xff]   ;;  %s1205_s8 = scalar_lea.vmem %s842_s7, 256  ;;  %p1210_p6 = scmp.lt.s32.totalorder %s842_s7, %s842_s7 }
  0x12   :  { %982 = vmatprep.subr.bf16.mxu0 %v1232_v0  ;;  %1002 = vmatprep.subr.bf16.mxu1 %v1232_v0  ;;  %v1141_v12 = vld [vmem:[#allocation2 + $0x58] sm:$0xff]   ;;  %v1135_v13 = vld [vmem:[#allocation2] sm:$0xff]   ;;  %v1142_v15 = vld [vmem:[#allocation2 + $0x50] sm:$0xff]   ;;  %p1206_p5 = scmp.ne.s32.totalorder %s842_s7, %s1205_s8  ;;  %p1211_p7 = scmp.lt.s32.totalorder %s1205_s8, %s1205_s8 }
  0x13   :  { %v1136_v14 = vld [vmem:[%s1357_s0] sm:$0xff]   ;;  %v1143_v16 = vld [vmem:[#allocation2 + $0x48] sm:$0xff]   ;;  %v1145_v18 = vld [vmem:[#allocation2 + $0xb8] sm:$0xff]  }
  0x14   :  { %v1144_v17 = vld [vmem:[#allocation2 + $0x40] sm:$0xff]   ;;  %v1146_v19 = vld [vmem:[#allocation2 + $0xb0] sm:$0xff]   ;;  %v1147_v20 = vld [vmem:[#allocation2 + $0xa8] sm:$0xff]   ;;  %p1212_p8 = por %p1211_p7, %p1210_p6 }
  0x15   :  { %983 = vmatpush3.bf16.msra.mxu0 %v1129_v2  ;;  %1003 = vmatpush3.bf16.msra.mxu1 %v1138_v6  ;;  %v1148_v21 = vld [vmem:[#allocation2 + $0xa0] sm:$0xff]   ;;  %v1149_v22 = vld [vmem:[#allocation2 + $0x98] sm:$0xff]   ;;  %v1150_v33 = vld [vmem:[#allocation2 + $0x90] sm:$0xff]  }
  0x16   :  { %984 = vmatprep.subr.bf16.mxu0 %v1232_v0  ;;  %1004 = vmatprep.subr.bf16.mxu1 %v1232_v0  ;;  %v853_v23 = vld [vmem:[%s1359_s2] ss:$0 sm:$0xff]  ;;  %v1151_v34 = vld [vmem:[#allocation2 + $0x88] sm:$0xff]   ;;  %v1153_v36 = vld [vmem:[#allocation2 + $0xf8] sm:$0xff]   ;;  %p1213_p9 = pnand %p1212_p8, %p1206_p5 }
  0x17   :  { %v1152_v35 = vld [vmem:[#allocation2 + $0x80] sm:$0xff]   ;;  %v1154_v37 = vld [vmem:[#allocation2 + $0xf0] sm:$0xff]   ;;  %v1155_v38 = vld [vmem:[#allocation2 + $0xe8] sm:$0xff]  }
  0x18   :  { %v1156_v39 = vld [vmem:[#allocation2 + $0xe0] sm:$0xff]   ;;  %v1157_v40 = vld [vmem:[#allocation2 + $0xd8] sm:$0xff]   ;;  %v1158_v51 = vld [vmem:[#allocation2 + $0xd0] sm:$0xff]  }
  0x19   :  { %985 = vmatpush3.bf16.msra.mxu0 %v1130_v3  ;;  %1005 = vmatpush3.bf16.msra.mxu1 %v1139_v8  ;;  %v863_v41 = vld [vmem:[%s1359_s2 + $0x1] ss:$0 sm:$0xff]  ;;  %v1159_v52 = vld [vmem:[#allocation2 + $0xc8] sm:$0xff]   ;;  %v1161_v54 = vld [vmem:[#allocation2 + $0x138] sm:$0xff]  }
  0x1a   :  { %986 = vmatprep.subr.bf16.mxu0 %v1232_v0  ;;  %1006 = vmatprep.subr.bf16.mxu1 %v1232_v0  ;;  %v1160_v53 = vld [vmem:[#allocation2 + $0xc0] sm:$0xff]   ;;  %v1162_v55 = vld [vmem:[#allocation2 + $0x130] sm:$0xff]   ;;  %v1163_v56 = vld [vmem:[#allocation2 + $0x128] sm:$0xff]  }
  0x1b   :  { %v1164_v57 = vld [vmem:[#allocation2 + $0x120] sm:$0xff]   ;;  %v1165_v58 = vld [vmem:[#allocation2 + $0x118] sm:$0xff]   ;;  %v1166_v6 = vld [vmem:[#allocation2 + $0x110] sm:$0xff]  }
  0x1c   :  { %v872_v59 = vld [vmem:[%s1359_s2 + $0x2] ss:$0 sm:$0xff] }
  0x1d   :  { %987 = vmatpush3.bf16.msra.mxu0 %v1131_v5  ;;  %1007 = vmatpush3.bf16.msra.mxu1 %v1140_v10  ;;  %v1168_v8 = vld [vmem:[#allocation2 + $0x100] sm:$0xff]   ;;  %v1170_v10 = vld [vmem:[#allocation2 + $0x170] sm:$0xff]  }
  0x1e   :  { %988 = vmatprep.subr.bf16.mxu0 %v1232_v0  ;;  %1008 = vmatprep.subr.bf16.mxu1 %v1232_v0 }
  0x21   :  { %989 = vmatpush3.bf16.msra.mxu0 %v1132_v7  ;;  %1009 = vmatpush3.bf16.msra.mxu1 %v1141_v12  ;;  %v1167_v7 = vld [vmem:[#allocation2 + $0x108] sm:$0xff]   ;;  %v1172_v12 = vld [vmem:[#allocation2 + $0x160] sm:$0xff]  }
  0x22   :  { %990 = vmatprep.subr.bf16.mxu0 %v1232_v0  ;;  %1010 = vmatprep.subr.bf16.mxu1 %v1232_v0 }
  0x25   :  { %991 = vmatpush3.bf16.msra.mxu0 %v1133_v9  ;;  %1011 = vmatpush3.bf16.msra.mxu1 %v1142_v15  ;;  %v1169_v9 = vld [vmem:[#allocation2 + $0x178] sm:$0xff]  }
  0x26   :  { %992 = vmatprep.subr.bf16.mxu0 %v1232_v0  ;;  %1012 = vmatprep.subr.bf16.mxu1 %v1232_v0 }
  0x29   :  { %993 = vmatpush3.bf16.msra.mxu0 %v1134_v11  ;;  %1013 = vmatpush3.bf16.msra.mxu1 %v1143_v16  ;;  %v1171_v11 = vld [vmem:[#allocation2 + $0x168] sm:$0xff]  }
  0x2a   :  { %994 = vmatprep.subr.bf16.mxu0 %v1232_v0  ;;  %1014 = vmatprep.subr.bf16.mxu1 %v1232_v0 }
  0x2d   :  { %995 = vmatpush3.bf16.msra.mxu0 %v1135_v13  ;;  %1015 = vmatpush3.bf16.msra.mxu1 %v1144_v17  ;;  %v1173_v13 = vld [vmem:[#allocation2 + $0x158] sm:$0xff]  }
  0x2e   :  { %1020 = vmatprep.subr.bf16.mxu0 %v1232_v0  ;;  %1040 = vmatprep.subr.bf16.mxu1 %v1232_v0 }
  0x30   :  { %997 = vmatmul.mubr.bf16.vlgmr.msra.gmra.mxu0 %v1136_v14  ;;  %v881_v14 = vld [vmem:[%s1359_s2 + $0x3] ss:$0 sm:$0xff] }
  0x31   :  { %1036 = vmatprep.mubr.msk.bf16.mxu0 %vm1233_vm0, %v1232_v0  ;;  %1021 = vmatpush3.bf16.msra.mxu0 %v1145_v18 }
  0x32   :  { %1022 = vmatprep.subr.bf16.mxu0 %v1232_v0 }
  0x35   :  { %1023 = vmatpush3.bf16.msra.mxu0 %v1146_v19 }
  0x36   :  { %1024 = vmatprep.subr.bf16.mxu0 %v1232_v0 }
  0x39   :  { %1025 = vmatpush3.bf16.msra.mxu0 %v1147_v20 }
  0x3a   :  { %1026 = vmatprep.subr.bf16.mxu0 %v1232_v0 }
  0x3d   :  { %1027 = vmatpush3.bf16.msra.mxu0 %v1148_v21 }
  0x3e   :  { %1028 = vmatprep.subr.bf16.mxu0 %v1232_v0 }
  0x41   :  { %1029 = vmatpush3.bf16.msra.mxu0 %v1149_v22 }
  0x42   :  { %1030 = vmatprep.subr.bf16.mxu0 %v1232_v0 }
  0x45   :  { %1031 = vmatpush3.bf16.msra.mxu0 %v1150_v33 }
  0x46   :  { %1032 = vmatprep.subr.bf16.mxu0 %v1232_v0 }
  0x49   :  { %1033 = vmatpush3.bf16.msra.mxu0 %v1151_v34 }
  0x4a   :  { %1034 = vmatprep.subr.bf16.mxu0 %v1232_v0 }
  0x4d   :  { %1035 = vmatpush3.bf16.msra.mxu0 %v1152_v35 }
  0x4e   :  { %1060 = vmatprep.subr.bf16.mxu0 %v1232_v0 }
  0xf0   :  { %v141_v24 = vpop.f32.mrf.mxu0 }
  0xf1   :  { %v142_v26 = vadd.f32 %v853_v23, %v141_v24  ;;  %v1174_v24 = vld [vmem:[#allocation2 + $0x150] sm:$0xff]  }
  0xf2   :  { %v998_v25 = vpop.f32.mrf.mxu0 }
  0xf3   :  { %v148_v30 = vmax.f32 %v142_v26, 0.0  ;;  %v1175_v25 = vld [vmem:[#allocation2 + $0x148] sm:$0xff]   ;;  %v1176_v26 = vld [vmem:[#allocation2 + $0x140] sm:$0xff]  }
  0xf4   :  { %v144_v27 = vpop.f32.mrf.mxu0 }
  0xf5   :  { %v145_v28 = vadd.f32 %v853_v23, %v144_v27  ;;  %v1177_v27 = vld [vmem:[#allocation2 + $0x1b8] sm:$0xff]  }
  0xf6   :  { %v999_v29 = vpop.f32.mrf.mxu0 }
  0xf7   :  { %v149_v31 = vmax.f32 %v145_v28, 0.0  ;;  %v1178_v28 = vld [vmem:[#allocation2 + $0x1b0] sm:$0xff]   ;;  %v1179_v29 = vld [vmem:[#allocation2 + $0x1a8] sm:$0xff]  }
  0xf9   :  { %v150_v32 = vpack.c.bf16 %v149_v31, %v148_v30  ;;  %v1180_v30 = vld [vmem:[#allocation2 + $0x1a0] sm:$0xff]   ;;  %v1181_v31 = vld [vmem:[#allocation2 + $0x198] sm:$0xff]  }
  0xfb   :  { %1017 = vmatmul.mubr.bf16.vlgmr.msra.gmra.mxu1 %v150_v32  ;;  %v890_v32 = vld [vmem:[%s1359_s2 + $0x4] ss:$0 sm:$0xff] }
  0xfc   :  { %1056 = vmatprep.mubr.msk.bf16.mxu1 %vm1233_vm0, %v1232_v0  ;;  %1041 = vmatpush3.bf16.msra.mxu1 %v1153_v36 }
  0xfd   :  { %1042 = vmatprep.subr.bf16.mxu1 %v1232_v0 }
 0x100   :  { %1043 = vmatpush3.bf16.msra.mxu1 %v1154_v37 }
 0x101   :  { %1044 = vmatprep.subr.bf16.mxu1 %v1232_v0 }
 0x104   :  { %1045 = vmatpush3.bf16.msra.mxu1 %v1155_v38 }
 0x105   :  { %1046 = vmatprep.subr.bf16.mxu1 %v1232_v0 }
 0x108   :  { %1047 = vmatpush3.bf16.msra.mxu1 %v1156_v39 }
 0x109   :  { %1048 = vmatprep.subr.bf16.mxu1 %v1232_v0 }
 0x10c   :  { %1049 = vmatpush3.bf16.msra.mxu1 %v1157_v40 }
 0x10d   :  { %1050 = vmatprep.subr.bf16.mxu1 %v1232_v0 }
 0x110   :  { %1051 = vmatpush3.bf16.msra.mxu1 %v1158_v51 }
 0x111   :  { %1052 = vmatprep.subr.bf16.mxu1 %v1232_v0 }
 0x114   :  { %1053 = vmatpush3.bf16.msra.mxu1 %v1159_v52 }
 0x115   :  { %1054 = vmatprep.subr.bf16.mxu1 %v1232_v0 }
 0x118   :  { %1055 = vmatpush3.bf16.msra.mxu1 %v1160_v53 }
 0x119   :  { %1080 = vmatprep.subr.bf16.mxu1 %v1232_v0 }
 0x1bb   :  { %v255_v42 = vpop.f32.mrf.mxu1 }
 0x1bc   :  { %v256_v44 = vadd.f32 %v863_v41, %v255_v42  ;;  %v1182_v42 = vld [vmem:[#allocation2 + $0x190] sm:$0xff]  }
 0x1bd   :  { %v1018_v43 = vpop.f32.mrf.mxu1 }
 0x1be   :  { %v262_v48 = vmax.f32 %v256_v44, 0.0  ;;  %v1183_v43 = vld [vmem:[#allocation2 + $0x188] sm:$0xff]   ;;  %v1184_v44 = vld [vmem:[#allocation2 + $0x180] sm:$0xff]  }
 0x1bf   :  { %v258_v45 = vpop.f32.mrf.mxu1 }
 0x1c0   :  { %v259_v46 = vadd.f32 %v863_v41, %v258_v45  ;;  %v899_v45 = vld [vmem:[%s1359_s2 + $0x5] ss:$0 sm:$0xff] }
 0x1c1   :  { %v1019_v47 = vpop.f32.mrf.mxu1 }
 0x1c2   :  { %v263_v49 = vmax.f32 %v259_v46, 0.0 }
 0x1c4   :  { %v264_v50 = vpack.c.bf16 %v263_v49, %v262_v48 }
 0x1c6   :  { %1037 = vmatmul.mubr.bf16.vlgmr.msra.gmra.mxu0 %v264_v50 }
 0x1c7   :  { %1076 = vmatprep.mubr.msk.bf16.mxu0 %vm1233_vm0, %v1232_v0  ;;  %1061 = vmatpush3.bf16.msra.mxu0 %v1161_v54 }
 0x1c8   :  { %1062 = vmatprep.subr.bf16.mxu0 %v1232_v0 }
 0x1cb   :  { %1063 = vmatpush3.bf16.msra.mxu0 %v1162_v55 }
 0x1cc   :  { %1064 = vmatprep.subr.bf16.mxu0 %v1232_v0 }
 0x1cf   :  { %1065 = vmatpush3.bf16.msra.mxu0 %v1163_v56 }
 0x1d0   :  { %1066 = vmatprep.subr.bf16.mxu0 %v1232_v0 }
 0x1d3   :  { %1067 = vmatpush3.bf16.msra.mxu0 %v1164_v57 }
 0x1d4   :  { %1068 = vmatprep.subr.bf16.mxu0 %v1232_v0 }
 0x1d7   :  { %1069 = vmatpush3.bf16.msra.mxu0 %v1165_v58 }
 0x1d8   :  { %1070 = vmatprep.subr.bf16.mxu0 %v1232_v0 }
 0x1db   :  { %1071 = vmatpush3.bf16.msra.mxu0 %v1166_v6 }
 0x1dc   :  { %1072 = vmatprep.subr.bf16.mxu0 %v1232_v0 }
 0x1df   :  { %1073 = vmatpush3.bf16.msra.mxu0 %v1167_v7 }
 0x1e0   :  { %1074 = vmatprep.subr.bf16.mxu0 %v1232_v0 }
 0x1e3   :  { %1075 = vmatpush3.bf16.msra.mxu0 %v1168_v8 }
 0x1e4   :  { %1100 = vmatprep.subr.bf16.mxu0 %v1232_v0 }
 0x286   :  { %v369_v60 = vpop.f32.mrf.mxu0 }
 0x287   :  { %v370_v62 = vadd.f32 %v872_v59, %v369_v60 }
 0x288   :  { %v1038_v61 = vpop.f32.mrf.mxu0 }
 0x289   :  { %v376_v3 = vmax.f32 %v370_v62, 0.0 }
 0x28a   :  { %v372_v63 = vpop.f32.mrf.mxu0 }
 0x28b   :  { %v373_v1 = vadd.f32 %v872_v59, %v372_v63 }
 0x28c   :  { %v1039_v2 = vpop.f32.mrf.mxu0 }
 0x28d   :  { %v377_v4 = vmax.f32 %v373_v1, 0.0 }
 0x28f   :  { %v378_v5 = vpack.c.bf16 %v377_v4, %v376_v3 }
 0x291   :  { %1057 = vmatmul.mubr.bf16.vlgmr.msra.gmra.mxu1 %v378_v5 }
 0x292   :  { %1096 = vmatprep.mubr.msk.bf16.mxu1 %vm1233_vm0, %v1232_v0  ;;  %1081 = vmatpush3.bf16.msra.mxu1 %v1169_v9 }
 0x293   :  { %1082 = vmatprep.subr.bf16.mxu1 %v1232_v0 }
 0x296   :  { %1083 = vmatpush3.bf16.msra.mxu1 %v1170_v10 }
 0x297   :  { %1084 = vmatprep.subr.bf16.mxu1 %v1232_v0 }
 0x29a   :  { %1085 = vmatpush3.bf16.msra.mxu1 %v1171_v11 }
 0x29b   :  { %1086 = vmatprep.subr.bf16.mxu1 %v1232_v0 }
 0x29e   :  { %1087 = vmatpush3.bf16.msra.mxu1 %v1172_v12 }
 0x29f   :  { %1088 = vmatprep.subr.bf16.mxu1 %v1232_v0 }
 0x2a2   :  { %1089 = vmatpush3.bf16.msra.mxu1 %v1173_v13 }
 0x2a3   :  { %1090 = vmatprep.subr.bf16.mxu1 %v1232_v0 }
 0x2a6   :  { %1091 = vmatpush3.bf16.msra.mxu1 %v1174_v24 }
 0x2a7   :  { %1092 = vmatprep.subr.bf16.mxu1 %v1232_v0 }
 0x2aa   :  { %1093 = vmatpush3.bf16.msra.mxu1 %v1175_v25 }
 0x2ab   :  { %1094 = vmatprep.subr.bf16.mxu1 %v1232_v0 }
 0x2ae   :  { %1095 = vmatpush3.bf16.msra.mxu1 %v1176_v26 }
 0x351   :  { %v483_v15 = vpop.f32.mrf.mxu1 }
 0x352   :  { %v484_v17 = vadd.f32 %v881_v14, %v483_v15 }
 0x353   :  { %v1058_v16 = vpop.f32.mrf.mxu1 }
 0x354   :  { %v490_v21 = vmax.f32 %v484_v17, 0.0 }
 0x355   :  { %v486_v18 = vpop.f32.mrf.mxu1 }
 0x356   :  { %v487_v19 = vadd.f32 %v881_v14, %v486_v18 }
 0x357   :  { %v1059_v20 = vpop.f32.mrf.mxu1 }
 0x358   :  { %v491_v22 = vmax.f32 %v487_v19, 0.0 }
 0x35a   :  { %v492_v23 = vpack.c.bf16 %v491_v22, %v490_v21 }
 0x35c   :  { %1077 = vmatmul.mubr.bf16.vlgmr.msra.gmra.mxu0 %v492_v23 }
 0x35d   :  { %1116 = vmatprep.mubr.msk.bf16.mxu0 %vm1233_vm0, %v1232_v0  ;;  %1101 = vmatpush3.bf16.msra.mxu0 %v1177_v27 }
 0x35e   :  { %1102 = vmatprep.subr.bf16.mxu0 %v1232_v0 }
 0x361   :  { %1103 = vmatpush3.bf16.msra.mxu0 %v1178_v28 }
 0x362   :  { %1104 = vmatprep.subr.bf16.mxu0 %v1232_v0 }
 0x365   :  { %1105 = vmatpush3.bf16.msra.mxu0 %v1179_v29 }
 0x366   :  { %1106 = vmatprep.subr.bf16.mxu0 %v1232_v0 }
 0x369   :  { %1107 = vmatpush3.bf16.msra.mxu0 %v1180_v30 }
 0x36a   :  { %1108 = vmatprep.subr.bf16.mxu0 %v1232_v0 }
 0x36d   :  { %1109 = vmatpush3.bf16.msra.mxu0 %v1181_v31 }
 0x36e   :  { %1110 = vmatprep.subr.bf16.mxu0 %v1232_v0 }
 0x371   :  { %1111 = vmatpush3.bf16.msra.mxu0 %v1182_v42 }
 0x372   :  { %1112 = vmatprep.subr.bf16.mxu0 %v1232_v0 }
 0x375   :  { %1113 = vmatpush3.bf16.msra.mxu0 %v1183_v43 }
 0x376   :  { %1114 = vmatprep.subr.bf16.mxu0 %v1232_v0  ;;  %v908_v0 = vld [vmem:[%s1359_s2 + $0x6] ss:$0 sm:$0xff] }
 0x379   :  { %1115 = vmatpush3.bf16.msra.mxu0 %v1184_v44 }
 0x41c   :  { %v597_v33 = vpop.f32.mrf.mxu0 }
 0x41d   :  { %v598_v35 = vadd.f32 %v890_v32, %v597_v33 }
 0x41e   :  { %v1078_v34 = vpop.f32.mrf.mxu0 }
 0x41f   :  { %v604_v39 = vmax.f32 %v598_v35, 0.0 }
 0x420   :  { %v600_v36 = vpop.f32.mrf.mxu0 }
 0x421   :  { %v601_v37 = vadd.f32 %v890_v32, %v600_v36 }
 0x422   :  { %v1079_v38 = vpop.f32.mrf.mxu0 }
 0x423   :  { %v605_v40 = vmax.f32 %v601_v37, 0.0 }
 0x425   :  { %v606_v41 = vpack.c.bf16 %v605_v40, %v604_v39 }
 0x427   :  { %1097 = vmatmul.mubr.bf16.vlgmr.msra.gmra.mxu1 %v606_v41 }
 0x4e7   :  { %v711_v46 = vpop.f32.mrf.mxu1 }
 0x4e8   :  { %v712_v48 = vadd.f32 %v899_v45, %v711_v46 }
 0x4e9   :  { %v1098_v47 = vpop.f32.mrf.mxu1 }
 0x4ea   :  { %v718_v52 = vmax.f32 %v712_v48, 0.0 }
 0x4eb   :  { %v714_v49 = vpop.f32.mrf.mxu1 }
 0x4ec   :  { %v715_v50 = vadd.f32 %v899_v45, %v714_v49 }
 0x4ed   :  { %v1099_v51 = vpop.f32.mrf.mxu1 }
 0x4ee   :  { %v719_v53 = vmax.f32 %v715_v50, 0.0 }
 0x4f0   :  { %v720_v54 = vpack.c.bf16 %v719_v53, %v718_v52 }
 0x4f2   :  { %1117 = vmatmul.mubr.bf16.vlgmr.msra.gmra.mxu0 %v720_v54 }
 0x5b2   :  { %v825_v55 = vpop.f32.mrf.mxu0 }
 0x5b3   :  { %v826_v56 = vadd.f32 %v908_v0, %v825_v55 }
 0x5b4   :  { %v1118_v57 = vpop.f32.mrf.mxu0 }
 0x5b5   :  { %v832_v58 = vmax.f32 %v826_v56, 0.0 }
 0x5b6   :  { %v828_v59 = vpop.f32.mrf.mxu0 }
 0x5b7   :  { %834 = vst [vmem:[#allocation5] sm:$0xff] %v832_v58  ;;  %v829_v60 = vadd.f32 %v908_v0, %v828_v59 }
 0x5b8   :  { %v1119_v61 = vpop.f32.mrf.mxu0 }
 0x5b9   :  { %v833_v62 = vmax.f32 %v829_v60, 0.0 }
 0x5bb   :  { %835 = vst [vmem:[#allocation5 + $0x8] sm:$0xff] %v833_v62 }
 0x5bc   :  { %1216 = shalt.err (!%p1213_p9)
}
 0x5bd   :  { %s1235_s2 = smov 128   ;;  %s1236_s9 = smov 8  }
 0x5be   :  { %847 = dma.vmem_to_hbm [thread:$0]  %s842_s7, 256, %s1360_s3, [#allocation4], %s1235_s2, %s1235_s2, %s1236_s9  }
 0x5bf   :  { %1227 = dma.done.wait [#allocation4], 256  }
 0x5c0   :  { %1228 = vsyncadd [#allocation4], 4294967040 }
 0x5c1   :  { %851 = vsyncpa [#allocation3], 1 }
 0x5c2   :  { %852 = vsyncpa [#allocation4], 1 }

</bundles_post_ra>
